<compile_context>
chip_gen: v7x
topology: tpu7x:2x2x1
jax: 0.10.0
libtpu: 0.0.40
codegen_flags: <defaults>
</compile_context>

<pallas_src>
import math

import numpy as np
import jax
import jax.numpy as jnp
from jax.experimental import pallas as pl
from jax.experimental.pallas import tpu as pltpu

# ----------------------------- model hyper-params -----------------------------
BS = 2
SEQ_LEN = 8
EMB = 16
KERNEL = (5, 13)              # (kH, kW)
OUT_CHS = 8
N_LAYERS = 2
RES_BLOCK_COUNT = 2
ANS_SIZE = 10

KH, KW = KERNEL
C = OUT_CHS
PAD = 2                       # seq padding of every conv (padding=(2, 0))
W_OUT = EMB - KW + 1          # 4 -> matches fc in_features = out_chs*seq_len*4
WC = W_OUT * C                # 32  (activation col index = w*C + c)
SPA = 16                      # padded rows per batch block (>= SEQ+2*PAD, mult of 8)
R = BS * SPA                  # 32  total activation rows; core row p = b*SPA + PAD + s
ANSP = 16                     # ANS padded to 16 -> SEQ*ANSP = 128 lanes (one vreg row)
NCOL = SEQ_LEN * ANSP         # 128 fc-GEMM output width (lane-dense)
K0 = KH * EMB                 # 80  layer-0 folded contraction depth
KM = KH * WC                  # 160 mid-layer folded contraction depth

# weight-slab row layout (width 2*WC = 64)
WM_OFF = K0                                   # mid-layer weights start row
B0_ROW = WM_OFF + N_LAYERS * KM               # 400: layer-0 combined bias row
BIAS_STRIDE = 8                               # keep each bias row 8-aligned
WSLAB_ROWS = B0_ROW + BIAS_STRIDE * (1 + N_LAYERS)   # 424

# const-slab row layout (width NCOL = 128)
GFC_OFF = 0
DMASK_OFF = WC                                # 32
FCB_ROW = DMASK_OFF + R                       # 64
CSLAB_ROWS = FCB_ROW + 8                      # 72

OUT_ROWS, OUT_COLS = 8, 128                   # lane-dense padded output block


# ------------------------------- fused kernel ---------------------------------
def _gated_cnn_kernel(x_ref, wslab_ref, cslab_ref, out_ref):
    f32 = jnp.float32

    # Core-row mask: 1 on the SEQ real seq positions of each batch block, 0 on the
    # zero-padding rows.  (SPA is a power of two, so "% SPA" is a bitwise and.)
    row = jax.lax.broadcasted_iota(jnp.int32, (R, WC), 0) & (SPA - 1)
    coremask = ((row >= PAD) & (row < PAD + SEQ_LEN)).astype(f32)

    def gate(acc):
        # acc: (R, 2*WC); A = cols [0, WC), gate B = cols [WC, 2*WC).
        # coremask re-zeroes padding rows so the next conv's shifted reads see zeros.
        return acc[:, :WC] * jax.nn.sigmoid(acc[:, WC:]) * coremask

    def tap_stack(a, base_shift):
        # Column-concatenate the KH row-shifted copies of `a`; tap dh occupies
        # cols [dh*width, (dh+1)*width) and its row p holds a[p + dh - base_shift].
        parts = []
        for dh in range(KH):
            sh = (base_shift - dh) % R
            parts.append(pltpu.roll(a, sh, 0) if sh else a)
        return jnp.concatenate(parts, axis=1)

    # ---- layer 0: conv_0 | conv_gate_0 as ONE GEMM (kH taps folded into K) ----
    zb = jnp.zeros((SPA - SEQ_LEN, EMB), f32)
    xparts = []
    for b in range(BS):                       # batch b at rows [b*SPA, b*SPA+SEQ)
        xparts.append(x_ref[b * SEQ_LEN:(b + 1) * SEQ_LEN, :])
        xparts.append(zb)                     # zeros at rows [b*SPA+SEQ, (b+1)*SPA)
    xsp = jnp.concatenate(xparts, axis=0)                                   # (R, EMB)
    xcat = tap_stack(xsp, 2 * PAD)                                          # (R, K0)
    w0 = wslab_ref[0:K0, :]                                                 # (K0, 2*WC)
    b0 = wslab_ref[B0_ROW:B0_ROW + 1, :]                                    # (1, 2*WC)
    h = gate(jnp.dot(xcat, w0, preferred_element_type=f32) + b0)            # (R, WC)
    res = h

    # ---- gated residual layers: conv[i] | conv_gate[i] as ONE GEMM each ----
    for i in range(N_LAYERS):
        hcat = tap_stack(h, PAD)                                            # (R, KM)
        wm = wslab_ref[WM_OFF + i * KM:WM_OFF + (i + 1) * KM, :]            # (KM, 2*WC)
        brow = B0_ROW + (i + 1) * BIAS_STRIDE
        bm = wslab_ref[brow:brow + 1, :]                                    # (1, 2*WC)
        hi = gate(jnp.dot(hcat, wm, preferred_element_type=f32) + bm)
        if i % RES_BLOCK_COUNT == 0:
            hi = hi + res
            res = hi
        h = hi

    # ---- FC tail: one GEMM + mask, then pure VPU/XLU reductions (no bsel/nsel) ----
    gfc = cslab_ref[GFC_OFF:GFC_OFF + WC, :]                                # (WC, 128)
    dmask = cslab_ref[DMASK_OFF:DMASK_OFF + R, :]                           # (R, 128)
    u = jnp.dot(h, gfc, preferred_element_type=f32) * dmask                 # (R, 128)
    # per-batch row reduction (batch blocks are 16 rows, sublane-aligned)
    v = jnp.concatenate(
        [jnp.sum(u[b * SPA:(b + 1) * SPA, :], axis=0, keepdims=True)
         for b in range(BS)], axis=0)                                       # (BS, 128)
    # seq-group reduction over the SEQ groups of ANSP=16 lanes
    r = v[:, 0:ANSP]
    for s in range(1, SEQ_LEN):
        r = r + v[:, s * ANSP:(s + 1) * ANSP]                               # (BS, 16)
    r = r + cslab_ref[FCB_ROW:FCB_ROW + 1, 0:ANSP]                          # + fc bias
    # lane-dense (8, 128) store; the wrapper slices back to (BS, ANS)
    out_ref[...] = jnp.concatenate(
        [jnp.concatenate([r, jnp.zeros((BS, OUT_COLS - ANSP), f32)], axis=1),
         jnp.zeros((OUT_ROWS - BS, OUT_COLS), f32)], axis=0)


@jax.jit
def gated_cnn_forward(x, params):
    x2d = x.reshape(BS * SEQ_LEN, EMB)
    vmem = pl.BlockSpec(memory_space=pltpu.MemorySpace.VMEM)
    out_padded = pl.pallas_call(
        _gated_cnn_kernel,
        out_shape=jax.ShapeDtypeStruct((OUT_ROWS, OUT_COLS), jnp.float32),
        in_specs=[vmem, vmem, vmem],
        out_specs=vmem,
    )(x2d, params["wslab"], params["cslab"])
    return out_padded[:BS, :ANS_SIZE]


# ------------------------------ parameter setup --------------------------------
def init_params(key):
    S, W = SEQ_LEN, W_OUT

    def nrm(shape, scale=1.0):
        nonlocal key
        key, sub = jax.random.split(key)
        return scale * jax.random.normal(sub, shape, dtype=jnp.float32)

    # ---- layer 0: Conv2d(1, C, (KH, KW), padding=(2,0)) + b_0 / c_0 params ----
    s0w = 1.0 / math.sqrt(KH * KW)
    wa = np.asarray(nrm((C, 1, KH, KW), s0w))[:, 0]       # conv_0.weight      (C,KH,KW)
    wb = np.asarray(nrm((C, 1, KH, KW), s0w))[:, 0]       # conv_gate_0.weight
    ba, bb = np.asarray(nrm((C,), s0w)), np.asarray(nrm((C,), s0w))
    b_0, c_0 = np.asarray(nrm((C,))), np.asarray(nrm((C,)))
    # stacked K-folded weight: rows dh*EMB + e, cols w*C + c (A) / WC + w*C + c (B)
    w0s = np.zeros((K0, 2 * WC), np.float32)
    for dh in range(KH):
        for w in range(W):
            for dw in range(KW):
                e = w + dw
                w0s[dh * EMB + e, w * C:(w + 1) * C] = wa[:, dh, dw]
                w0s[dh * EMB + e, WC + w * C:WC + (w + 1) * C] = wb[:, dh, dw]
    b0row = np.concatenate([np.tile(ba + b_0, W), np.tile(bb + c_0, W)])

    # ---- mid layers: Conv2d(C, C, (KH, 1), padding=(2,0)) + b[i] / c[i] ----
    smw = 1.0 / math.sqrt(KH * C)
    wm_blocks, bm_rows = [], []
    for _ in range(N_LAYERS):
        wc = np.asarray(nrm((C, C, KH, 1), smw))[:, :, :, 0]   # conv[i].weight (co,ci,dh)
        wg = np.asarray(nrm((C, C, KH, 1), smw))[:, :, :, 0]   # conv_gate[i].weight
        bc, bg = np.asarray(nrm((C,), smw)), np.asarray(nrm((C,), smw))
        b_i, c_i = np.asarray(nrm((C,))), np.asarray(nrm((C,)))
        wms = np.zeros((KM, 2 * WC), np.float32)
        for dh in range(KH):
            for w in range(W):
                blk_c = wc[:, :, dh].T          # (ci, co)
                blk_g = wg[:, :, dh].T
                wms[dh * WC + w * C:dh * WC + (w + 1) * C, w * C:(w + 1) * C] = blk_c
                wms[dh * WC + w * C:dh * WC + (w + 1) * C,
                    WC + w * C:WC + (w + 1) * C] = blk_g
        wm_blocks.append(wms)
        bm_rows.append(np.concatenate([np.tile(bc + b_i, W), np.tile(bg + c_i, W)]))

    # ---- fc: Linear(C*S*W, ANS); PyTorch flatten index = c*S*W + s*W + w ----
    fc_in = C * S * W
    sf = 1.0 / math.sqrt(fc_in)
    fcw = np.asarray(nrm((ANS_SIZE, fc_in), sf)).reshape(ANS_SIZE, C, S, W)
    fcb = np.asarray(nrm((ANS_SIZE,), sf))
    gfc = np.zeros((WC, NCOL), np.float32)     # rows w*C+c, cols s*ANSP + n (n < ANS)
    for s in range(S):
        for w in range(W):
            for c in range(C):
                gfc[w * C + c, s * ANSP:s * ANSP + ANS_SIZE] = fcw[:, c, s, w]
    dmask = np.zeros((R, NCOL), np.float32)    # row (b,s) keeps only its own seq group
    for b in range(BS):
        for s in range(S):
            dmask[b * SPA + PAD + s, s * ANSP:s * ANSP + ANS_SIZE] = 1.0

    # ---- pack everything into two lane-dense slabs ----
    wslab = np.zeros((WSLAB_ROWS, 2 * WC), np.float32)
    wslab[0:K0] = w0s
    for i in range(N_LAYERS):
        wslab[WM_OFF + i * KM:WM_OFF + (i + 1) * KM] = wm_blocks[i]
    wslab[B0_ROW] = b0row
    for i in range(N_LAYERS):
        wslab[B0_ROW + (i + 1) * BIAS_STRIDE] = bm_rows[i]

    cslab = np.zeros((CSLAB_ROWS, NCOL), np.float32)
    cslab[GFC_OFF:GFC_OFF + WC] = gfc
    cslab[DMASK_OFF:DMASK_OFF + R] = dmask
    cslab[FCB_ROW, 0:ANS_SIZE] = fcb

    return {"wslab": jnp.asarray(wslab), "cslab": jnp.asarray(cslab)}


# ----------------------------------- main --------------------------------------
if __name__ == "__main__":
    root = jax.random.PRNGKey(0)
    kx, kp = jax.random.split(root)
    x = jax.random.normal(kx, (BS, SEQ_LEN, EMB), dtype=jnp.float32)
    params = init_params(kp)

    out = gated_cnn_forward(x, params)
    out = jax.block_until_ready(out)
    assert out.shape == (BS, ANS_SIZE), out.shape
    assert bool(jnp.all(jnp.isfinite(out)))
    print("KERNEL_OK")
</pallas_src>

<mosaic_0001>
module attributes {stable_mosaic.version = 11 : i64} {
  func.func @_gated_cnn_kernel(%arg0: memref<16x16xf32, #tpu.memory_space<vmem>>, %arg1: memref<424x64xf32, #tpu.memory_space<vmem>>, %arg2: memref<72x128xf32, #tpu.memory_space<vmem>>, %arg3: memref<8x128xf32, #tpu.memory_space<vmem>>) attributes {dimension_semantics = [], scalar_prefetch = 0 : i64, scratch_operands = 0 : i64, tpu.core_type = #tpu.core_type<tc>} {
    %0 = tpu.iota {dimensions = array<i32: 0>} : vector<32x32xi32>
    %c15_i32 = arith.constant 15 : i32
    %1 = vector.broadcast %c15_i32 : i32 to vector<32x32xi32>
    %2 = arith.andi %0, %1 : vector<32x32xi32>
    %c2_i32 = arith.constant 2 : i32
    %3 = vector.broadcast %c2_i32 : i32 to vector<32x32xi32>
    %4 = arith.cmpi sge, %2, %3 : vector<32x32xi32>
    %c10_i32 = arith.constant 10 : i32
    %5 = vector.broadcast %c10_i32 : i32 to vector<32x32xi32>
    %6 = arith.cmpi slt, %2, %5 : vector<32x32xi32>
    %7 = arith.andi %4, %6 : vector<32x32xi1>
    %8 = arith.extui %7 : vector<32x32xi1> to vector<32x32xi32>
    %9 = arith.sitofp %8 : vector<32x32xi32> to vector<32x32xf32>
    %cst = arith.constant 0.000000e+00 : f32
    %10 = vector.broadcast %cst : f32 to vector<8x16xf32>
    %c0 = arith.constant 0 : index
    %c0_0 = arith.constant 0 : index
    %11 = vector.load %arg0[%c0, %c0_0] : memref<16x16xf32, #tpu.memory_space<vmem>>, vector<8x16xf32>
    %c8 = arith.constant 8 : index
    %c0_1 = arith.constant 0 : index
    %12 = vector.load %arg0[%c8, %c0_1] : memref<16x16xf32, #tpu.memory_space<vmem>>, vector<8x16xf32>
    %13 = tpu.concatenate %11, %10, %12, %10 in 0 : vector<8x16xf32>, vector<8x16xf32>, vector<8x16xf32>, vector<8x16xf32> -> vector<32x16xf32>
    %c4_i32 = arith.constant 4 : i32
    %14 = tpu.dynamic_rotate %13 by %c4_i32 dim 0 : vector<32x16xf32>, i32 -> vector<32x16xf32>
    %c3_i32 = arith.constant 3 : i32
    %15 = tpu.dynamic_rotate %13 by %c3_i32 dim 0 : vector<32x16xf32>, i32 -> vector<32x16xf32>
    %c2_i32_2 = arith.constant 2 : i32
    %16 = tpu.dynamic_rotate %13 by %c2_i32_2 dim 0 : vector<32x16xf32>, i32 -> vector<32x16xf32>
    %c1_i32 = arith.constant 1 : i32
    %17 = tpu.dynamic_rotate %13 by %c1_i32 dim 0 : vector<32x16xf32>, i32 -> vector<32x16xf32>
    %18 = tpu.concatenate %14, %15, %16, %17, %13 in 1 : vector<32x16xf32>, vector<32x16xf32>, vector<32x16xf32>, vector<32x16xf32>, vector<32x16xf32> -> vector<32x80xf32>
    %c0_3 = arith.constant 0 : index
    %c0_4 = arith.constant 0 : index
    %19 = vector.load %arg1[%c0_3, %c0_4] : memref<424x64xf32, #tpu.memory_space<vmem>>, vector<80x64xf32>
    %c400 = arith.constant 400 : index
    %c0_5 = arith.constant 0 : index
    %20 = vector.load %arg1[%c400, %c0_5] : memref<424x64xf32, #tpu.memory_space<vmem>>, vector<1x64xf32>
    %cst_6 = arith.constant dense<0.000000e+00> : vector<32x64xf32>
    %21 = tpu.matmul %18, %19, %cst_6 {dimension_numbers = #tpu.dot_dimension_numbers<[1], [0], [0], [1], [0, 0, 1, 1], [], []>} : vector<32x80xf32>, vector<80x64xf32>, vector<32x64xf32> -> vector<32x64xf32>
    %22 = vector.broadcast %20 : vector<1x64xf32> to vector<32x64xf32>
    %23 = arith.addf %21, %22 : vector<32x64xf32>
    %24 = vector.extract_strided_slice %23 {offsets = [0, 0], sizes = [32, 32], strides = [1, 1]} : vector<32x64xf32> to vector<32x32xf32>
    %25 = vector.extract_strided_slice %23 {offsets = [0, 32], sizes = [32, 32], strides = [1, 1]} : vector<32x64xf32> to vector<32x32xf32>
    %26 = arith.negf %25 : vector<32x32xf32>
    %27 = math.exp %26 : vector<32x32xf32>
    %cst_7 = arith.constant 1.000000e+00 : f32
    %28 = vector.broadcast %cst_7 : f32 to vector<32x32xf32>
    %29 = arith.addf %28, %27 : vector<32x32xf32>
    %30 = arith.divf %28, %29 : vector<32x32xf32>
    %31 = arith.mulf %24, %30 : vector<32x32xf32>
    %32 = arith.mulf %31, %9 : vector<32x32xf32>
    %c2_i32_8 = arith.constant 2 : i32
    %33 = tpu.dynamic_rotate %32 by %c2_i32_8 dim 0 : vector<32x32xf32>, i32 -> vector<32x32xf32>
    %c1_i32_9 = arith.constant 1 : i32
    %34 = tpu.dynamic_rotate %32 by %c1_i32_9 dim 0 : vector<32x32xf32>, i32 -> vector<32x32xf32>
    %c31_i32 = arith.constant 31 : i32
    %35 = tpu.dynamic_rotate %32 by %c31_i32 dim 0 : vector<32x32xf32>, i32 -> vector<32x32xf32>
    %c30_i32 = arith.constant 30 : i32
    %36 = tpu.dynamic_rotate %32 by %c30_i32 dim 0 : vector<32x32xf32>, i32 -> vector<32x32xf32>
    %37 = tpu.concatenate %33, %34, %32, %35, %36 in 1 : vector<32x32xf32>, vector<32x32xf32>, vector<32x32xf32>, vector<32x32xf32>, vector<32x32xf32> -> vector<32x160xf32>
    %c80 = arith.constant 80 : index
    %c0_10 = arith.constant 0 : index
    %38 = vector.load %arg1[%c80, %c0_10] : memref<424x64xf32, #tpu.memory_space<vmem>>, vector<160x64xf32>
    %c408 = arith.constant 408 : index
    %c0_11 = arith.constant 0 : index
    %39 = vector.load %arg1[%c408, %c0_11] : memref<424x64xf32, #tpu.memory_space<vmem>>, vector<1x64xf32>
    %cst_12 = arith.constant dense<0.000000e+00> : vector<32x64xf32>
    %40 = tpu.matmul %37, %38, %cst_12 {dimension_numbers = #tpu.dot_dimension_numbers<[1], [0], [0], [1], [0, 0, 1, 1], [], []>} : vector<32x160xf32>, vector<160x64xf32>, vector<32x64xf32> -> vector<32x64xf32>
    %41 = vector.broadcast %39 : vector<1x64xf32> to vector<32x64xf32>
    %42 = arith.addf %40, %41 : vector<32x64xf32>
    %43 = vector.extract_strided_slice %42 {offsets = [0, 0], sizes = [32, 32], strides = [1, 1]} : vector<32x64xf32> to vector<32x32xf32>
    %44 = vector.extract_strided_slice %42 {offsets = [0, 32], sizes = [32, 32], strides = [1, 1]} : vector<32x64xf32> to vector<32x32xf32>
    %45 = arith.negf %44 : vector<32x32xf32>
    %46 = math.exp %45 : vector<32x32xf32>
    %cst_13 = arith.constant 1.000000e+00 : f32
    %47 = vector.broadcast %cst_13 : f32 to vector<32x32xf32>
    %48 = arith.addf %47, %46 : vector<32x32xf32>
    %49 = arith.divf %47, %48 : vector<32x32xf32>
    %50 = arith.mulf %43, %49 : vector<32x32xf32>
    %51 = arith.mulf %50, %9 : vector<32x32xf32>
    %52 = arith.addf %51, %32 : vector<32x32xf32>
    %c2_i32_14 = arith.constant 2 : i32
    %53 = tpu.dynamic_rotate %52 by %c2_i32_14 dim 0 : vector<32x32xf32>, i32 -> vector<32x32xf32>
    %c1_i32_15 = arith.constant 1 : i32
    %54 = tpu.dynamic_rotate %52 by %c1_i32_15 dim 0 : vector<32x32xf32>, i32 -> vector<32x32xf32>
    %c31_i32_16 = arith.constant 31 : i32
    %55 = tpu.dynamic_rotate %52 by %c31_i32_16 dim 0 : vector<32x32xf32>, i32 -> vector<32x32xf32>
    %c30_i32_17 = arith.constant 30 : i32
    %56 = tpu.dynamic_rotate %52 by %c30_i32_17 dim 0 : vector<32x32xf32>, i32 -> vector<32x32xf32>
    %57 = tpu.concatenate %53, %54, %52, %55, %56 in 1 : vector<32x32xf32>, vector<32x32xf32>, vector<32x32xf32>, vector<32x32xf32>, vector<32x32xf32> -> vector<32x160xf32>
    %c240 = arith.constant 240 : index
    %c0_18 = arith.constant 0 : index
    %58 = vector.load %arg1[%c240, %c0_18] : memref<424x64xf32, #tpu.memory_space<vmem>>, vector<160x64xf32>
    %c416 = arith.constant 416 : index
    %c0_19 = arith.constant 0 : index
    %59 = vector.load %arg1[%c416, %c0_19] : memref<424x64xf32, #tpu.memory_space<vmem>>, vector<1x64xf32>
    %cst_20 = arith.constant dense<0.000000e+00> : vector<32x64xf32>
    %60 = tpu.matmul %57, %58, %cst_20 {dimension_numbers = #tpu.dot_dimension_numbers<[1], [0], [0], [1], [0, 0, 1, 1], [], []>} : vector<32x160xf32>, vector<160x64xf32>, vector<32x64xf32> -> vector<32x64xf32>
    %61 = vector.broadcast %59 : vector<1x64xf32> to vector<32x64xf32>
    %62 = arith.addf %60, %61 : vector<32x64xf32>
    %63 = vector.extract_strided_slice %62 {offsets = [0, 0], sizes = [32, 32], strides = [1, 1]} : vector<32x64xf32> to vector<32x32xf32>
    %64 = vector.extract_strided_slice %62 {offsets = [0, 32], sizes = [32, 32], strides = [1, 1]} : vector<32x64xf32> to vector<32x32xf32>
    %65 = arith.negf %64 : vector<32x32xf32>
    %66 = math.exp %65 : vector<32x32xf32>
    %cst_21 = arith.constant 1.000000e+00 : f32
    %67 = vector.broadcast %cst_21 : f32 to vector<32x32xf32>
    %68 = arith.addf %67, %66 : vector<32x32xf32>
    %69 = arith.divf %67, %68 : vector<32x32xf32>
    %70 = arith.mulf %63, %69 : vector<32x32xf32>
    %71 = arith.mulf %70, %9 : vector<32x32xf32>
    %c0_22 = arith.constant 0 : index
    %c0_23 = arith.constant 0 : index
    %72 = vector.load %arg2[%c0_22, %c0_23] : memref<72x128xf32, #tpu.memory_space<vmem>>, vector<32x128xf32>
    %c32 = arith.constant 32 : index
    %c0_24 = arith.constant 0 : index
    %73 = vector.load %arg2[%c32, %c0_24] : memref<72x128xf32, #tpu.memory_space<vmem>>, vector<32x128xf32>
    %cst_25 = arith.constant dense<0.000000e+00> : vector<32x128xf32>
    %74 = tpu.matmul %71, %72, %cst_25 {dimension_numbers = #tpu.dot_dimension_numbers<[1], [0], [0], [1], [0, 0, 1, 1], [], []>} : vector<32x32xf32>, vector<32x128xf32>, vector<32x128xf32> -> vector<32x128xf32>
    %75 = arith.mulf %74, %73 : vector<32x128xf32>
    %76 = vector.extract_strided_slice %75 {offsets = [0, 0], sizes = [16, 128], strides = [1, 1]} : vector<32x128xf32> to vector<16x128xf32>
    %cst_26 = arith.constant dense<0.000000e+00> : vector<128xf32>
    %77 = vector.multi_reduction <add>, %76, %cst_26 [0] : vector<16x128xf32> to vector<128xf32>
    %78 = vector.shape_cast %77 : vector<128xf32> to vector<1x128xf32>
    %79 = vector.extract_strided_slice %75 {offsets = [16, 0], sizes = [16, 128], strides = [1, 1]} : vector<32x128xf32> to vector<16x128xf32>
    %cst_27 = arith.constant dense<0.000000e+00> : vector<128xf32>
    %80 = vector.multi_reduction <add>, %79, %cst_27 [0] : vector<16x128xf32> to vector<128xf32>
    %81 = vector.shape_cast %80 : vector<128xf32> to vector<1x128xf32>
    %82 = tpu.concatenate %78, %81 in 0 : vector<1x128xf32>, vector<1x128xf32> -> vector<2x128xf32>
    %83 = vector.extract_strided_slice %82 {offsets = [0, 0], sizes = [2, 16], strides = [1, 1]} : vector<2x128xf32> to vector<2x16xf32>
    %84 = vector.extract_strided_slice %82 {offsets = [0, 16], sizes = [2, 16], strides = [1, 1]} : vector<2x128xf32> to vector<2x16xf32>
    %85 = arith.addf %83, %84 : vector<2x16xf32>
    %86 = vector.extract_strided_slice %82 {offsets = [0, 32], sizes = [2, 16], strides = [1, 1]} : vector<2x128xf32> to vector<2x16xf32>
    %87 = arith.addf %85, %86 : vector<2x16xf32>
    %88 = vector.extract_strided_slice %82 {offsets = [0, 48], sizes = [2, 16], strides = [1, 1]} : vector<2x128xf32> to vector<2x16xf32>
    %89 = arith.addf %87, %88 : vector<2x16xf32>
    %90 = vector.extract_strided_slice %82 {offsets = [0, 64], sizes = [2, 16], strides = [1, 1]} : vector<2x128xf32> to vector<2x16xf32>
    %91 = arith.addf %89, %90 : vector<2x16xf32>
    %92 = vector.extract_strided_slice %82 {offsets = [0, 80], sizes = [2, 16], strides = [1, 1]} : vector<2x128xf32> to vector<2x16xf32>
    %93 = arith.addf %91, %92 : vector<2x16xf32>
    %94 = vector.extract_strided_slice %82 {offsets = [0, 96], sizes = [2, 16], strides = [1, 1]} : vector<2x128xf32> to vector<2x16xf32>
    %95 = arith.addf %93, %94 : vector<2x16xf32>
    %96 = vector.extract_strided_slice %82 {offsets = [0, 112], sizes = [2, 16], strides = [1, 1]} : vector<2x128xf32> to vector<2x16xf32>
    %97 = arith.addf %95, %96 : vector<2x16xf32>
    %c64 = arith.constant 64 : index
    %c0_28 = arith.constant 0 : index
    %98 = vector.load %arg2[%c64, %c0_28] : memref<72x128xf32, #tpu.memory_space<vmem>>, vector<1x16xf32>
    %99 = vector.broadcast %98 : vector<1x16xf32> to vector<2x16xf32>
    %100 = arith.addf %97, %99 : vector<2x16xf32>
    %cst_29 = arith.constant 0.000000e+00 : f32
    %101 = vector.broadcast %cst_29 : f32 to vector<2x112xf32>
    %102 = tpu.concatenate %100, %101 in 1 : vector<2x16xf32>, vector<2x112xf32> -> vector<2x128xf32>
    %cst_30 = arith.constant 0.000000e+00 : f32
    %103 = vector.broadcast %cst_30 : f32 to vector<6x128xf32>
    %104 = tpu.concatenate %102, %103 in 0 : vector<2x128xf32>, vector<6x128xf32> -> vector<8x128xf32>
    %c0_31 = arith.constant 0 : index
    %c0_32 = arith.constant 0 : index
    %105 = vector.load %arg3[%c0_31, %c0_32] : memref<8x128xf32, #tpu.memory_space<vmem>>, vector<8x128xf32>
    tpu.vector_store %arg3[%c0_31, %c0_32], %104 {strides = array<i32>} : memref<8x128xf32, #tpu.memory_space<vmem>>, vector<8x128xf32>,
    return
  }
}

</mosaic_0001>

<bundles_post_ra>
// kernel: gated_cnn_forward.1
= control target key start
LH: loop header
LB: loop body
LE: loop exit
PB: predicated region body
PF: predicated region fallthrough
CT: control target
= control target key end

     0   :  { %v14_v0 = vlaneseq  ;;  %s1286_s22 = smov 32   ;;  %s1287_s23 = smov 16   ;;  %v1290_v32 = vmov 0.0   ;;  %vm133_vm4 = vcmask 130048   ;;  %vm138_vm5 = vcmask 261120   ;;  %s1863_s0 = inlined_call_operand.vmem [shape: f32[16,16], index: 0, kind: input, shape index: {}]   ;;  %s1864_s1 = inlined_call_operand.vmem [shape: f32[424,64], index: 1, kind: input, shape index: {}]   ;;  %s1865_s2 = inlined_call_operand.vmem [shape: f32[72,128], index: 2, kind: input, shape index: {}]   ;;  %s1866_s3 = inlined_call_operand.vmem [shape: f32[8,128], index: 3, kind: output, shape index: {}]  }
   0x1   :  { %v1318_v1 = vld [vmem:[%s1863_s0] sm:$0xff]  ;;  %v154_v6 = vld [vmem:[%s1864_s1 + $0x8] sm:$0xff]  ;;  %v155_v10 = vld [vmem:[%s1864_s1 + $0x10] sm:$0xff]  ;;  %s1289_s11 = smov 64   ;;  %vm143_vm6 = vcmask 392192   ;;  %vm148_vm7 = vcmask 523264  }
   0x2   :  { %v153_v2 = vld [vmem:[%s1864_s1] sm:$0xff]  ;;  %v1323_v3 = vshrl.u32 %v14_v0, 7  ;;  %v59_v4 = vrot.slane %v1318_v1, 6  ;;  %v52_v5 = vrot.slane %v1318_v1, 5  ;;  %v156_v11 = vld [vmem:[%s1864_s1 + $0x18] sm:$0xff]  ;;  %v158_v13 = vld [vmem:[%s1864_s1 + $0x28] sm:$0xff] }
   0x3   :  { %v1111_v7 = vpack.c.bf16 %v154_v6, %v153_v2  ;;  %v157_v12 = vld [vmem:[%s1864_s1 + $0x20] sm:$0xff]  ;;  %v66_v16 = vrot.slane %v1318_v1, 7  ;;  %v1359_v17 = vld [vmem:[%s1863_s0 + $0x8] sm:$0xff]  ;;  %v1115_v18 = vpack.c.bf16 %v156_v11, %v155_v10  ;;  %v159_v20 = vld [vmem:[%s1864_s1 + $0x30] sm:$0xff]  ;;  %s1288_s0 = smov 48   ;;  %v45_v40 = vrot.slane %v1318_v1, 4 }
   0x4   :  { %vm61_vm0 = vcmp.lt.s32.totalorder %v1323_v3, 2  ;;  %vm54_vm1 = vcmp.lt.s32.totalorder %v1323_v3, 3  ;;  %vm68_vm2 = vcmp.lt.s32.totalorder %v1323_v3, 1  ;;  %v1119_v19 = vpack.c.bf16 %v158_v13, %v157_v12  ;;  %v160_v21 = vld [vmem:[%s1864_s1 + $0x38] sm:$0xff]  ;;  %v161_v26 = vld [vmem:[%s1864_s1 + $0x40] sm:$0xff]  ;;  %v162_v27 = vld [vmem:[%s1864_s1 + $0x48] sm:$0xff] }
   0x5   :  { %v65_v8 = vsel %vm61_vm0, 0.0, %v59_v4  ;;  %v58_v9 = vsel %vm54_vm1, 0.0, %v52_v5  ;;  %1112 = vmatprep.subr.bf16.mxu0 %v1111_v7  ;;  %v64_v14 = vsel %vm61_vm0, %v59_v4, 0.0  ;;  %v57_v15 = vsel %vm54_vm1, %v52_v5, 0.0  ;;  %v1017_v12 = vld [vmem:[%s1864_s1 + $0x190] ss:$0 sm:$0xff] }
   0x6   :  { %93 = vrot.lane.b32.xlu1 %v65_v8, %s1286_s22  ;;  %77 = vrot.lane.b32.xlu0 %v58_v9, %s1287_s23  ;;  %v71_v22 = vsel %vm68_vm2, %v66_v16, 0.0  ;;  %v72_v23 = vsel %vm68_vm2, 0.0, %v66_v16  ;;  %v53_v24 = vrot.slane %v1359_v17, 5  ;;  %v1123_v25 = vpack.c.bf16 %v160_v21, %v159_v20  ;;  %s1291_s14 = smov 96   ;;  %s1293_s24 = smov 112  }
   0x7   :  { %1114 = vmatpush3.bf16.msra.mxu0 %v1111_v7  ;;  %v1127_v29 = vpack.c.bf16 %v162_v27, %v161_v26  ;;  %v60_v31 = vrot.slane %v1359_v17, 6  ;;  %v67_v35 = vrot.slane %v1359_v17, 7  ;;  %vm47_vm3 = vcmp.lt.s32.totalorder %v1323_v3, 4  ;;  %s1294_s25 = smov 80  }
   0x8   :  { %1116 = vmatprep.subr.bf16.mxu0 %v1115_v18  ;;  %v56_v28 = vsel %vm54_vm1, 0.0, %v53_v24  ;;  %v55_v30 = vsel %vm54_vm1, %v53_v24, 0.0  ;;  %v51_v43 = vsel %vm47_vm3, 0.0, %v45_v40  ;;  %v50_v47 = vsel %vm47_vm3, %v45_v40, 0.0  ;;  %v411_v40 = vld [vmem:[%s1864_s1 + $0x60] sm:$0xff] }
   0x9   :  { %v62_v33 = vsel %vm61_vm0, %v60_v31, 0.0  ;;  %v63_v34 = vsel %vm61_vm0, 0.0, %v60_v31  ;;  %v69_v36 = vsel %vm68_vm2, %v67_v35, 0.0  ;;  %v70_v37 = vsel %vm68_vm2, 0.0, %v67_v35 }
   0xa   :  { %95 = vrot.lane.b32.xlu1 %v64_v14, %s1286_s22  ;;  %79 = vrot.lane.b32.xlu0 %v57_v15, %s1287_s23  ;;  %vm168_vm8 = vcmask 654336   ;;  %v46_v59 = vrot.slane %v1359_v17, 4  ;;  %vm343_vm11 = vcmp.lt.s32.totalorder %v1323_v3, 6  ;;  %vm334_vm14 = vcmp.lt.s32.totalorder %v1323_v3, 7 }
   0xb   :  { %1118 = vmatpush3.bf16.msra.mxu0 %v1115_v18  ;;  %vm404_vm15 = vcmask 785408   ;;  %vm1006_vm1 = vcmask 1041408  }
   0xc   :  { %1120 = vmatprep.subr.bf16.mxu0 %v1119_v19  ;;  %v48_v60 = vsel %vm47_vm3, %v46_v59, 0.0  ;;  %v49_v63 = vsel %vm47_vm3, 0.0, %v46_v59 }
   0xe   :  { %111 = vrot.lane.b32.xlu1 %v71_v22, %s1288_s0  ;;  %109 = vrot.lane.b32.xlu0 %v72_v23, %s1288_s0 }
   0xf   :  { %1122 = vmatpush3.bf16.msra.mxu0 %v1119_v19 }
  0x10   :  { %1124 = vmatprep.subr.bf16.mxu0 %v1123_v25 }
  0x12   :  { %81 = vrot.lane.b32.xlu1 %v56_v28, %s1287_s23  ;;  %124 = vrot.lane.b32.xlu0 %v1318_v1, %s1289_s11 }
  0x13   :  { %1126 = vmatpush3.bf16.msra.mxu0 %v1123_v25 }
  0x14   :  { %1128 = vmatprep.subr.bf16.mxu0 %v1127_v29 }
  0x16   :  { %83 = vrot.lane.b32.xlu1 %v55_v30, %s1287_s23  ;;  %126 = vrot.lane.b32.xlu0 %v1290_v32, %s1289_s11 }
  0x17   :  { %1130 = vmatpush3.bf16.msra.mxu0 %v1127_v29 }
  0x1a   :  { %99 = vrot.lane.b32.xlu1 %v62_v33, %s1286_s22  ;;  %97 = vrot.lane.b32.xlu0 %v63_v34, %s1286_s22 }
  0x1e   :  { %115 = vrot.lane.b32.xlu1 %v69_v36, %s1288_s0  ;;  %113 = vrot.lane.b32.xlu0 %v70_v37, %s1288_s0 }
  0x22   :  { %128 = vrot.lane.b32.xlu0 %v1359_v17, %s1289_s11 }
  0x78   :  { %v94_v38 = vpop.permute.xlu1 %93  ;;  %v78_v39 = vpop.permute.xlu0 %77 }
  0x79   :  { %v134_v44 = vsel %vm133_vm4, %v51_v43, %v78_v39  ;;  %v410_v39 = vld [vmem:[%s1864_s1 + $0x58] sm:$0xff]  ;;  %v412_v43 = vld [vmem:[%s1864_s1 + $0x68] sm:$0xff] }
  0x7a   :  { %v139_v48 = vsel %vm138_vm5, %v134_v44, %v94_v38  ;;  %v409_v38 = vld [vmem:[%s1864_s1 + $0x50] sm:$0xff]  ;;  %v1135_v44 = vpack.c.bf16 %v412_v43, %v411_v40 }
  0x7c   :  { %v96_v41 = vpop.permute.xlu1 %95  ;;  %v80_v42 = vpop.permute.xlu0 %79 }
  0x7d   :  { %v135_v49 = vsel %vm133_vm4, %v50_v47, %v80_v42  ;;  %v1132_v42 = vpack.c.bf16 %v410_v39, %v409_v38 }
  0x7e   :  { %v140_v54 = vsel %vm138_vm5, %v135_v49, %v96_v41  ;;  %v1292_v41 = vmov 0.0|0.0   ;;  %v416_v49 = vld [vmem:[%s1864_s1 + $0x88] sm:$0xff] }
  0x7f   :  { %1131 = vmatprep.subr.bf16.mxu1 %v1292_v41  ;;  %1161 = vmatprep.subr.bf16.mxu0 %v1292_v41 }
  0x80   :  { %v112_v45 = vpop.permute.xlu1 %111  ;;  %v110_v46 = vpop.permute.xlu0 %109  ;;  %1133 = vmatpush1.bf16.msra.mxu1 %v1132_v42 }
  0x81   :  { %v144_v50 = vsel %vm143_vm6, %v139_v48, %v110_v46  ;;  %v145_v55 = vsel %vm143_vm6, %v140_v54, %v112_v45  ;;  %1134 = vmatprep.subr.bf16.mxu1 %v1292_v41  ;;  %v413_v45 = vld [vmem:[%s1864_s1 + $0x70] sm:$0xff]  ;;  %v414_v46 = vld [vmem:[%s1864_s1 + $0x78] sm:$0xff]  ;;  %v415_v48 = vld [vmem:[%s1864_s1 + $0x80] sm:$0xff] }
  0x82   :  { %v1138_v47 = vpack.c.bf16 %v414_v46, %v413_v45  ;;  %v419_v54 = vld [vmem:[%s1864_s1 + $0xa0] sm:$0xff] }
  0x84   :  { %v82_v51 = vpop.permute.xlu1 %81  ;;  %v125_v52 = vpop.permute.xlu0 %124  ;;  %1136 = vmatpush1.bf16.msra.mxu1 %v1135_v44 }
  0x85   :  { %v149_v53 = vsel %vm148_vm7, %v144_v50, %v125_v52  ;;  %v136_v4 = vsel %vm133_vm4, %v49_v63, %v82_v51  ;;  %1137 = vmatprep.subr.bf16.mxu1 %v1292_v41  ;;  %v1141_v50 = vpack.c.bf16 %v416_v49, %v415_v48  ;;  %v417_v51 = vld [vmem:[%s1864_s1 + $0x90] sm:$0xff]  ;;  %v418_v52 = vld [vmem:[%s1864_s1 + $0x98] sm:$0xff] }
  0x86   :  { %1091 = vmatprep.mubr.msk.f32.mxu0 %vm168_vm8, %v149_v53  ;;  %v1144_v53 = vpack.c.bf16 %v418_v52, %v417_v51 }
  0x88   :  { %v84_v56 = vpop.permute.xlu1 %83  ;;  %v127_v57 = vpop.permute.xlu0 %126  ;;  %1139 = vmatpush1.bf16.msra.mxu1 %v1138_v47 }
  0x89   :  { %v150_v58 = vsel %vm148_vm7, %v145_v55, %v127_v57  ;;  %v137_v0 = vsel %vm133_vm4, %v48_v60, %v84_v56  ;;  %1140 = vmatprep.subr.bf16.mxu1 %v1292_v41  ;;  %v420_v55 = vld [vmem:[%s1864_s1 + $0xa8] sm:$0xff]  ;;  %v421_v60 = vld [vmem:[%s1864_s1 + $0xb0] sm:$0xff] }
  0x8a   :  { %1092 = vmatmul.mubr.msk.f32.vlgmr.msra.gmra.mrb[0].mxu0 %vm168_vm8, %v150_v58  ;;  %v1147_v56 = vpack.c.bf16 %v420_v55, %v419_v54  ;;  %v19_v58 = vand.u32 15, %v1323_v3 }
  0x8c   :  { %v100_v61 = vpop.permute.xlu1 %99  ;;  %v98_v62 = vpop.permute.xlu0 %97  ;;  %1142 = vmatpush1.bf16.msra.mxu1 %v1141_v50  ;;  %vm23_vm9 = vcmp.ge.s32.totalorder %v19_v58, 2 }
  0x8d   :  { %v142_v5 = vsel %vm138_vm5, %v137_v0, %v100_v61  ;;  %v141_v6 = vsel %vm138_vm5, %v136_v4, %v98_v62  ;;  %1143 = vmatprep.subr.bf16.mxu1 %v1292_v41  ;;  %v422_v61 = vld [vmem:[%s1864_s1 + $0xb8] sm:$0xff]  ;;  %v423_v62 = vld [vmem:[%s1864_s1 + $0xc0] sm:$0xff]  ;;  %v424_v0 = vld [vmem:[%s1864_s1 + $0xc8] sm:$0xff] }
  0x8e   :  { %v1150_v63 = vpack.c.bf16 %v422_v61, %v421_v60  ;;  %v1153_v4 = vpack.c.bf16 %v424_v0, %v423_v62 }
  0x90   :  { %v116_v1 = vpop.permute.xlu1 %115  ;;  %v114_v2 = vpop.permute.xlu0 %113  ;;  %1145 = vmatpush1.bf16.msra.mxu1 %v1144_v53 }
  0x91   :  { %v147_v7 = vsel %vm143_vm6, %v142_v5, %v116_v1  ;;  %v146_v8 = vsel %vm143_vm6, %v141_v6, %v114_v2  ;;  %1146 = vmatprep.subr.bf16.mxu1 %v1292_v41  ;;  %v1518_v5 = vsel %vm23_vm9, 1.0, %v1290_v32  ;;  %v18_v6 = vadd.s32 24, %v1323_v3 }
  0x92   :  { %v152_v11 = vsel %vm148_vm7, %v147_v7, %v127_v57  ;;  %v16_v57 = vadd.s32 8, %v1323_v3 }
  0x94   :  { %v129_v9 = vpop.permute.xlu0 %128  ;;  %1148 = vmatpush1.bf16.msra.mxu1 %v1147_v56  ;;  %v20_v59 = vand.u32 15, %v16_v57 }
  0x95   :  { %v151_v10 = vsel %vm148_vm7, %v146_v8, %v129_v9  ;;  %1149 = vmatprep.subr.bf16.mxu1 %v1292_v41 }
  0x96   :  { %1094 = vmatprep.mubr.msk.f32.mxu0 %vm168_vm8, %v151_v10  ;;  %vm28_vm10 = vcmp.lt.s32.totalorder %v20_v59, 10 }
  0x97   :  { %1095 = vmatmul.mubr.msk.f32.gmra.mrb[2].mxu0 %vm168_vm8, %v152_v11  ;;  %v1523_v7 = vsel %vm28_vm10, 1.0, %v1290_v32 }
  0x98   :  { %1151 = vmatpush1.bf16.msra.mxu1 %v1150_v63 }
  0x99   :  { %1152 = vmatprep.subr.bf16.mxu1 %v1292_v41 }
  0x9c   :  { %1154 = vmatpush1.bf16.msra.mxu1 %v1153_v4 }
  0x9d   :  { %1155 = vmatprep.subr.bf16.mxu1 %v1292_v41 }
 0x15d   :  { %v1093_v13 = vpop.f32.mrb[0].mxu0 }
 0x15e   :  { %v1442_v14 = vadd.f32 %v1093_v13, %v1017_v12  ;;  %v247_v15 = vpop.f32.mrb[1].mxu0  ;;  %v17_v13 = vadd.s32 16, %v1323_v3 }
 0x15f   :  { %v1444_v16 = vadd.f32 %v1017_v12, %v247_v15  ;;  %v425_v15 = vld [vmem:[%s1864_s1 + $0xd0] sm:$0xff] }
 0x160   :  { %v1023_v17 = vmul.f32 -1.442695, %v1442_v14 }
 0x161   :  { %v1022_v18 = vmul.f32 -1.442695, %v1444_v16 }
 0x162   :  { %1238 = vpow2.f32 %v1023_v17 }
 0x163   :  { %1240 = vpow2.f32 %v1022_v18 }
 0x16a   :  { %v1096_v19 = vpop.f32.mrb[2].mxu0 }
 0x16b   :  { %v1448_v20 = vadd.f32 %v1096_v19, %v1017_v12  ;;  %v257_v21 = vpop.f32.mrb[3].mxu0 }
 0x16c   :  { %v1239_v22 = vpop.eup %1238  ;;  %v1450_v23 = vadd.f32 %v1017_v12, %v257_v21  ;;  %v22_v12 = vand.u32 15, %v18_v6 }
 0x16d   :  { %v1241_v24 = vpop.eup %1240  ;;  %v1025_v25 = vmul.f32 -1.442695, %v1448_v20  ;;  %v279_v28 = vadd.f32 1.0, %v1239_v22  ;;  %v21_v22 = vand.u32 15, %v17_v13 }
 0x16e   :  { %v278_v26 = vadd.f32 1.0, %v1241_v24  ;;  %v1024_v27 = vmul.f32 -1.442695, %v1450_v23  ;;  %vm30_vm12 = vcmp.lt.s32.totalorder %v22_v12, 10  ;;  %v427_v24 = vld [vmem:[%s1864_s1 + $0xe0] sm:$0xff] }
 0x16f   :  { %vm25_vm13 = vcmp.ge.s32.totalorder %v21_v22, 2 }
 0x170   :  { %1242 = vrcp.f32 %v278_v26  ;;  %v1561_v26 = vsel %vm30_vm12, 1.0, %v1290_v32 }
 0x171   :  { %1244 = vpow2.f32 %v1025_v25  ;;  %v428_v25 = vld [vmem:[%s1864_s1 + $0xe8] sm:$0xff] }
 0x172   :  { %1246 = vpow2.f32 %v1024_v27 }
 0x173   :  { %1248 = vrcp.f32 %v279_v28  ;;  %v1159_v28 = vpack.c.bf16 %v428_v25, %v427_v24 }
 0x17a   :  { %v1243_v29 = vpop.eup %1242 }
 0x17b   :  { %v1245_v30 = vpop.eup %1244  ;;  %294 = vrot.lane.b32.xlu1 %v1243_v29, %s1291_s14 }
 0x17c   :  { %v1247_v31 = vpop.eup %1246  ;;  %v281_v33 = vadd.f32 1.0, %v1245_v30 }
 0x17d   :  { %v1249_v34 = vpop.eup %1248  ;;  %v280_v35 = vadd.f32 1.0, %v1247_v31 }
 0x17e   :  { %1250 = vrcp.f32 %v281_v33  ;;  %v1569_v33 = vsel %vm25_vm13, 1.0, %v1290_v32 }
 0x17f   :  { %296 = vrot.lane.b32.xlu1 %v1249_v34, %s1291_s14  ;;  %1252 = vrcp.f32 %v280_v35 }
 0x188   :  { %v1251_v36 = vpop.eup %1250 }
 0x189   :  { %300 = vrot.lane.b32.xlu0 %v1251_v36, %s1291_s14  ;;  %v1253_v37 = vpop.eup %1252 }
 0x18d   :  { %298 = vrot.lane.b32.xlu0 %v1253_v37, %s1291_s14 }
 0x1ed   :  { %v295_v1 = vpop.permute.xlu1 %294 }
 0x1ee   :  { %v306_v2 = vmul.f32 %v295_v1, %v1444_v16  ;;  %v426_v16 = vld [vmem:[%s1864_s1 + $0xd8] sm:$0xff] }
 0x1ef   :  { %v1156_v19 = vpack.c.bf16 %v426_v16, %v425_v15 }
 0x1f0   :  { %v1526_v9 = vmul.f32 %v1518_v5, %v306_v2 }
 0x1f1   :  { %v297_v8 = vpop.permute.xlu1 %296  ;;  %1157 = vmatpush1.bf16.msra.mxu1 %v1156_v19 }
 0x1f2   :  { %v307_v10 = vmul.f32 %v297_v8, %v1442_v14  ;;  %v339_v17 = vrot.slane %v1526_v9, 2  ;;  %1158 = vmatprep.subr.bf16.mxu1 %v1292_v41  ;;  %v322_v36 = vrot.slane %v1526_v9, 7  ;;  %v330_v42 = vrot.slane %v1526_v9, 1 }
 0x1f3   :  { %v314_v54 = vrot.slane %v1526_v9, 6 }
 0x1f4   :  { %v1531_v11 = vmul.f32 %v1523_v7, %v307_v10 }
 0x1f5   :  { %1160 = vmatpush1.bf16.msra.mxu1 %v1159_v28 }
 0x1f6   :  { %v1208_v14 = vpack.i.bf16 %v1531_v11, %v1526_v9  ;;  %v340_v18 = vrot.slane %v1531_v11, 2  ;;  %v323_v31 = vrot.slane %v1531_v11, 7  ;;  %v331_v40 = vrot.slane %v1531_v11, 1 }
 0x1f7   :  { %v315_v57 = vrot.slane %v1531_v11, 6 }
 0x1f8   :  { %1209 = vrot.lane.b32.xlu0 %v1208_v14, %s1289_s11  ;;  %v346_v21 = vsel %vm343_vm11, %v339_v17, %v340_v18  ;;  %v337_v46 = vsel %vm334_vm14, %v330_v42, %v331_v40 }
 0x1f9   :  { %1027 = vmatprep.mubr.msk.f32.mxu1 %vm138_vm5, %v346_v21  ;;  %v320_v6 = vsel %vm61_vm0, %v314_v54, %v315_v57 }
 0x1fb   :  { %v301_v27 = vpop.permute.xlu0 %300 }
 0x1fc   :  { %v309_v29 = vmul.f32 %v301_v27, %v1448_v20  ;;  %v328_v20 = vsel %vm68_vm2, %v322_v36, %v323_v31 }
 0x1fe   :  { %v1565_v30 = vmul.f32 %v1561_v26, %v309_v29 }
 0x1ff   :  { %v299_v34 = vpop.permute.xlu0 %298 }
 0x200   :  { %v308_v35 = vmul.f32 %v299_v34, %v1450_v23  ;;  %v325_v37 = vrot.slane %v1565_v30, 7  ;;  %v333_v48 = vrot.slane %v1565_v30, 1  ;;  %v317_v52 = vrot.slane %v1565_v30, 6 }
 0x201   :  { %v342_v21 = vrot.slane %v1565_v30, 2 }
 0x202   :  { %v1575_v38 = vmul.f32 %v1569_v33, %v308_v35  ;;  %v329_v39 = vsel %vm68_vm2, %v325_v37, %v322_v36  ;;  %v338_v51 = vsel %vm334_vm14, %v333_v48, %v330_v42  ;;  %v321_v58 = vsel %vm61_vm0, %v317_v52, %v314_v54 }
 0x203   :  { %v1213_v32 = vpack.i.bf16 %v328_v20, %v329_v39  ;;  %v347_v36 = vsel %vm343_vm11, %v342_v21, %v339_v17 }
 0x204   :  { %v324_v23 = vrot.slane %v1575_v38, 7  ;;  %v332_v43 = vrot.slane %v1575_v38, 1  ;;  %v341_v63 = vrot.slane %v1575_v38, 2  ;;  %v316_v2 = vrot.slane %v1575_v38, 6 }
 0x205   :  { %1214 = vrot.lane.b32.xlu1 %v1213_v32, %s1286_s22 }
 0x206   :  { %v327_v44 = vsel %vm68_vm2, %v323_v31, %v324_v23  ;;  %v336_v45 = vsel %vm334_vm14, %v331_v40, %v332_v43  ;;  %v335_v49 = vsel %vm334_vm14, %v332_v43, %v333_v48  ;;  %v326_v50 = vsel %vm68_vm2, %v324_v23, %v325_v37  ;;  %v1026_v40 = vld [vmem:[%s1864_s1 + $0x198] ss:$0 sm:$0xff] }
 0x207   :  { %356 = vrot.lane.b32.xlu0 %v327_v44, %s1286_s22  ;;  %v1218_v47 = vpack.i.bf16 %v336_v45, %v337_v46  ;;  %v345_v16 = vsel %vm343_vm11, %v340_v18, %v341_v63  ;;  %v319_v14 = vsel %vm61_vm0, %v315_v57, %v316_v2  ;;  %v344_v18 = vsel %vm343_vm11, %v341_v63, %v342_v21  ;;  %v682_v21 = vld [vmem:[%s1864_s1 + $0x128] sm:$0xff] }
 0x208   :  { %v318_v29 = vsel %vm61_vm0, %v316_v2, %v317_v52 }
 0x209   :  { %1219 = vrot.lane.b32.xlu1 %v1218_v47, %s1291_s14 }
 0x20b   :  { %388 = vrot.lane.b32.xlu0 %v335_v49, %s1291_s14 }
 0x20d   :  { %372 = vrot.lane.b32.xlu1 %v1575_v38, %s1289_s11 }
 0x20f   :  { %374 = vrot.lane.b32.xlu0 %v1565_v30, %s1289_s11 }
 0x211   :  { %358 = vrot.lane.b32.xlu1 %v326_v50, %s1286_s22 }
 0x215   :  { %390 = vrot.lane.b32.xlu1 %v338_v51, %s1291_s14 }
 0x26a   :  { %v1210_v55 = vpop.permute.xlu0 %1209 }
 0x26b   :  { %v1211_v61 = vunpack.i.l.bf16 %v1210_v55  ;;  %v1212_v13 = vunpack.i.h.bf16 %v1210_v55 }
 0x277   :  { %v1215_v53 = vpop.permute.xlu1 %1214 }
 0x278   :  { %v1216_v56 = vunpack.i.l.bf16 %v1215_v53  ;;  %v1217_v59 = vunpack.i.h.bf16 %v1215_v53 }
 0x279   :  { %v357_v0 = vpop.permute.xlu0 %356 }
 0x27a   :  { %v396_v60 = vsel %vm138_vm5, %v321_v58, %v1216_v56  ;;  %v397_v12 = vsel %vm138_vm5, %v320_v6, %v1217_v59  ;;  %v398_v22 = vsel %vm138_vm5, %v319_v14, %v357_v0  ;;  %v676_v6 = vld [vmem:[%s1864_s1 + $0xf8] sm:$0xff] }
 0x27b   :  { %v1220_v62 = vpop.permute.xlu1 %1219  ;;  %v400_v4 = vsel %vm148_vm7, %v396_v60, %v1211_v61  ;;  %v401_v19 = vsel %vm148_vm7, %v397_v12, %v1212_v13  ;;  %v678_v12 = vld [vmem:[%s1864_s1 + $0x108] sm:$0xff] }
 0x27c   :  { %v1221_v1 = vunpack.i.l.bf16 %v1220_v62  ;;  %v1222_v8 = vunpack.i.h.bf16 %v1220_v62 }
 0x27d   :  { %v389_v24 = vpop.permute.xlu0 %388 }
 0x27e   :  { %v405_v10 = vsel %vm404_vm15, %v400_v4, %v1221_v1  ;;  %v406_v25 = vsel %vm404_vm15, %v401_v19, %v1222_v8  ;;  %v675_v4 = vld [vmem:[%s1864_s1 + $0xf0] sm:$0xff]  ;;  %v677_v8 = vld [vmem:[%s1864_s1 + $0x100] sm:$0xff] }
 0x27f   :  { %v373_v15 = vpop.permute.xlu1 %372  ;;  %511 = vmatmul.mubr.f32.vlgmr.msra.gmra.mrb[0].mxu1 %v405_v10  ;;  %v1162_v10 = vpack.c.bf16 %v676_v6, %v675_v4  ;;  %v1165_v13 = vpack.c.bf16 %v678_v12, %v677_v8  ;;  %v681_v19 = vld [vmem:[%s1864_s1 + $0x120] sm:$0xff] }
 0x280   :  { %1028 = vmatprep.mubr.msk.f32.mxu1 %vm138_vm5, %v345_v16  ;;  %v402_v27 = vsel %vm148_vm7, %v398_v22, %v373_v15  ;;  %v679_v15 = vld [vmem:[%s1864_s1 + $0x110] sm:$0xff]  ;;  %v680_v16 = vld [vmem:[%s1864_s1 + $0x118] sm:$0xff]  ;;  %v1171_v22 = vpack.c.bf16 %v682_v21, %v681_v19 }
 0x281   :  { %v407_v34 = vsel %vm404_vm15, %v402_v27, %v389_v24  ;;  %v375_v37 = vpop.permute.xlu0 %374  ;;  %1163 = vmatpush1.bf16.msra.mxu0 %v1162_v10  ;;  %v1168_v14 = vpack.c.bf16 %v680_v16, %v679_v15  ;;  %v683_v24 = vld [vmem:[%s1864_s1 + $0x130] sm:$0xff] }
 0x282   :  { %1164 = vmatprep.subr.bf16.mxu0 %v1292_v41 }
 0x283   :  { %v359_v28 = vpop.permute.xlu1 %358  ;;  %516 = vmatmul.mubr.f32.gmra.mrb[2].mxu1 %v406_v25  ;;  %v684_v25 = vld [vmem:[%s1864_s1 + $0x138] sm:$0xff] }
 0x284   :  { %1029 = vmatprep.mubr.msk.f32.mxu1 %vm138_vm5, %v344_v18  ;;  %v399_v31 = vsel %vm138_vm5, %v318_v29, %v359_v28  ;;  %v1174_v27 = vpack.c.bf16 %v684_v25, %v683_v24  ;;  %v685_v28 = vld [vmem:[%s1864_s1 + $0x140] sm:$0xff]  ;;  %v686_v18 = vld [vmem:[%s1864_s1 + $0x148] sm:$0xff] }
 0x285   :  { %v403_v20 = vsel %vm148_vm7, %v399_v31, %v375_v37  ;;  %1166 = vmatpush1.bf16.msra.mxu0 %v1165_v13  ;;  %v1177_v29 = vpack.c.bf16 %v686_v18, %v685_v28 }
 0x286   :  { %1167 = vmatprep.subr.bf16.mxu0 %v1292_v41 }
 0x287   :  { %v391_v35 = vpop.permute.xlu1 %390  ;;  %521 = vmatmul.mubr.f32.gmra.mrb[4].mxu1 %v407_v34  ;;  %v687_v34 = vld [vmem:[%s1864_s1 + $0x150] sm:$0xff] }
 0x288   :  { %1030 = vmatprep.mubr.msk.f32.mxu1 %vm138_vm5, %v347_v36  ;;  %v408_v39 = vsel %vm404_vm15, %v403_v20, %v391_v35  ;;  %v688_v35 = vld [vmem:[%s1864_s1 + $0x158] sm:$0xff]  ;;  %v689_v36 = vld [vmem:[%s1864_s1 + $0x160] sm:$0xff] }
 0x289   :  { %1169 = vmatpush1.bf16.msra.mxu0 %v1168_v14  ;;  %v1180_v20 = vpack.c.bf16 %v688_v35, %v687_v34 }
 0x28a   :  { %1170 = vmatprep.subr.bf16.mxu0 %v1292_v41 }
 0x28b   :  { %526 = vmatmul.mubr.f32.gmra.mrb[6].mxu1 %v408_v39  ;;  %v690_v39 = vld [vmem:[%s1864_s1 + $0x168] sm:$0xff] }
 0x28d   :  { %1172 = vmatpush1.bf16.msra.mxu0 %v1171_v22 }
 0x28e   :  { %1173 = vmatprep.subr.bf16.mxu0 %v1292_v41 }
 0x291   :  { %1175 = vmatpush1.bf16.msra.mxu0 %v1174_v27 }
 0x292   :  { %1176 = vmatprep.subr.bf16.mxu0 %v1292_v41 }
 0x295   :  { %1178 = vmatpush1.bf16.msra.mxu0 %v1177_v29 }
 0x296   :  { %1179 = vmatprep.subr.bf16.mxu0 %v1292_v41 }
 0x299   :  { %1181 = vmatpush1.bf16.msra.mxu0 %v1180_v20 }
 0x29a   :  { %1182 = vmatprep.subr.bf16.mxu0 %v1292_v41 }
 0x352   :  { %v512_v32 = vpop.f32.mrb[0].mxu1 }
 0x353   :  { %v1651_v23 = vadd.f32 %v1026_v40, %v512_v32  ;;  %v514_v42 = vpop.f32.mrb[1].mxu1  ;;  %v1183_v32 = vpack.c.bf16 %v690_v39, %v689_v36 }
 0x355   :  { %v1031_v43 = vmul.f32 -1.442695, %v1651_v23  ;;  %1184 = vmatpush1.bf16.msra.mxu0 %v1183_v32 }
 0x356   :  { %v517_v44 = vpop.f32.mrb[2].mxu1  ;;  %1185 = vmatprep.subr.bf16.mxu0 %v1292_v41 }
 0x357   :  { %1254 = vpow2.f32 %v1031_v43  ;;  %v1654_v17 = vadd.f32 %v1026_v40, %v517_v44  ;;  %v519_v45 = vpop.f32.mrb[3].mxu1 }
 0x359   :  { %v1032_v46 = vmul.f32 -1.442695, %v1654_v17 }
 0x35a   :  { %v522_v47 = vpop.f32.mrb[4].mxu1 }
 0x35b   :  { %1256 = vpow2.f32 %v1032_v46  ;;  %v1657_v48 = vadd.f32 %v1026_v40, %v522_v47  ;;  %v524_v49 = vpop.f32.mrb[5].mxu1  ;;  %v691_v46 = vld [vmem:[%s1864_s1 + $0x170] sm:$0xff]  ;;  %v692_v47 = vld [vmem:[%s1864_s1 + $0x178] sm:$0xff] }
 0x35d   :  { %v1033_v50 = vmul.f32 -1.442695, %v1657_v48 }
 0x35e   :  { %v527_v51 = vpop.f32.mrb[6].mxu1 }
 0x35f   :  { %v1660_v52 = vadd.f32 %v1026_v40, %v527_v51  ;;  %v529_v53 = vpop.f32.mrb[7].mxu1  ;;  %1258 = vpow2.f32 %v1033_v50 }
 0x360   :  { %v1186_v53 = vpack.c.bf16 %v692_v47, %v691_v46 }
 0x361   :  { %v1255_v54 = vpop.eup %1254  ;;  %v1034_v55 = vmul.f32 -1.442695, %v1660_v52 }
 0x362   :  { %v543_v56 = vadd.f32 1.0, %v1255_v54  ;;  %1187 = vmatpush1.bf16.msra.mxu0 %v1186_v53 }
 0x363   :  { %1260 = vpow2.f32 %v1034_v55  ;;  %1188 = vmatprep.subr.bf16.mxu0 %v1292_v41 }
 0x364   :  { %1262 = vrcp.f32 %v543_v56  ;;  %v693_v56 = vld [vmem:[%s1864_s1 + $0x180] sm:$0xff] }
 0x365   :  { %v1257_v57 = vpop.eup %1256 }
 0x366   :  { %v544_v58 = vadd.f32 1.0, %v1257_v57  ;;  %v694_v57 = vld [vmem:[%s1864_s1 + $0x188] sm:$0xff] }
 0x368   :  { %1264 = vrcp.f32 %v544_v58 }
 0x369   :  { %v1259_v59 = vpop.eup %1258 }
 0x36a   :  { %v545_v63 = vadd.f32 1.0, %v1259_v59  ;;  %v1189_v59 = vpack.c.bf16 %v694_v57, %v693_v56 }
 0x36c   :  { %1190 = vmatpush1.bf16.msra.mxu0 %v1189_v59 }
 0x36d   :  { %v1261_v60 = vpop.eup %1260 }
 0x36e   :  { %v1263_v61 = vpop.eup %1262  ;;  %v546_v62 = vadd.f32 1.0, %v1261_v60 }
 0x36f   :  { %559 = vrot.lane.b32.xlu0 %v1263_v61, %s1291_s14 }
 0x370   :  { %1266 = vrcp.f32 %v546_v62 }
 0x371   :  { %1268 = vrcp.f32 %v545_v63 }
 0x372   :  { %v1265_v0 = vpop.eup %1264 }
 0x373   :  { %561 = vrot.lane.b32.xlu0 %v1265_v0, %s1291_s14 }
 0x37a   :  { %v1267_v1 = vpop.eup %1266 }
 0x37b   :  { %565 = vrot.lane.b32.xlu1 %v1267_v1, %s1291_s14  ;;  %v1269_v2 = vpop.eup %1268 }
 0x37f   :  { %563 = vrot.lane.b32.xlu1 %v1269_v2, %s1291_s14 }
 0x3e1   :  { %v560_v31 = vpop.permute.xlu0 %559 }
 0x3e2   :  { %v571_v37 = vmul.f32 %v560_v31, %v1651_v23 }
 0x3e4   :  { %v575_v40 = vmul.f32 %v1518_v5, %v571_v37 }
 0x3e5   :  { %v562_v42 = vpop.permute.xlu0 %561 }
 0x3e6   :  { %v572_v43 = vmul.f32 %v562_v42, %v1654_v17  ;;  %v1726_v44 = vadd.f32 %v575_v40, %v1526_v9 }
 0x3e8   :  { %v576_v45 = vmul.f32 %v1523_v7, %v572_v43  ;;  %v607_v9 = vrot.slane %v1726_v44, 2  ;;  %v583_v51 = vrot.slane %v1726_v44, 6  ;;  %v591_v1 = vrot.slane %v1726_v44, 7 }
 0x3e9   :  { %v599_v13 = vrot.slane %v1726_v44, 1 }
 0x3ea   :  { %v580_v23 = vadd.f32 %v576_v45, %v1531_v11 }
 0x3ec   :  { %v1223_v17 = vpack.i.bf16 %v580_v23, %v1726_v44  ;;  %v608_v49 = vrot.slane %v580_v23, 2  ;;  %v584_v54 = vrot.slane %v580_v23, 6  ;;  %v592_v63 = vrot.slane %v580_v23, 7 }
 0x3ed   :  { %v566_v50 = vpop.permute.xlu1 %565  ;;  %v600_v6 = vrot.slane %v580_v23, 1 }
 0x3ee   :  { %v574_v11 = vmul.f32 %v566_v50, %v1660_v52  ;;  %1224 = vrot.lane.b32.xlu1 %v1223_v17, %s1289_s11  ;;  %v613_v55 = vsel %vm343_vm11, %v607_v9, %v608_v49  ;;  %v589_v58 = vsel %vm61_vm0, %v583_v51, %v584_v54  ;;  %v597_v41 = vsel %vm68_vm2, %v591_v1, %v592_v63 }
 0x3ef   :  { %1036 = vmatprep.mubr.msk.f32.mxu0 %vm138_vm5, %v613_v55  ;;  %v605_v24 = vsel %vm334_vm14, %v599_v13, %v600_v6 }
 0x3f0   :  { %v578_v52 = vmul.f32 %v1561_v26, %v574_v11 }
 0x3f1   :  { %v564_v60 = vpop.permute.xlu1 %563 }
 0x3f2   :  { %v582_v61 = vadd.f32 %v578_v52, %v1565_v30  ;;  %v573_v62 = vmul.f32 %v564_v60, %v1657_v48  ;;  %v845_v60 = vld [vmem:[%s1865_s2] sm:$0xff] }
 0x3f4   :  { %v577_v0 = vmul.f32 %v1569_v33, %v573_v62  ;;  %v594_v2 = vrot.slane %v582_v61, 7  ;;  %v586_v4 = vrot.slane %v582_v61, 6  ;;  %v610_v8 = vrot.slane %v582_v61, 2 }
 0x3f5   :  { %v602_v29 = vrot.slane %v582_v61, 1 }
 0x3f6   :  { %v581_v10 = vadd.f32 %v577_v0, %v1575_v38  ;;  %v598_v30 = vsel %vm68_vm2, %v594_v2, %v591_v1  ;;  %v590_v48 = vsel %vm61_vm0, %v586_v4, %v583_v51  ;;  %v614_v15 = vsel %vm343_vm11, %v610_v8, %v607_v9 }
 0x3f7   :  { %v1228_v12 = vpack.i.bf16 %v597_v41, %v598_v30  ;;  %v606_v36 = vsel %vm334_vm14, %v602_v29, %v599_v13 }
 0x3f8   :  { %v593_v16 = vrot.slane %v581_v10, 7  ;;  %v601_v14 = vrot.slane %v581_v10, 1  ;;  %v585_v19 = vrot.slane %v581_v10, 6  ;;  %v609_v21 = vrot.slane %v581_v10, 2 }
 0x3f9   :  { %1229 = vrot.lane.b32.xlu0 %v1228_v12, %s1286_s22 }
 0x3fa   :  { %v596_v38 = vsel %vm68_vm2, %v592_v63, %v593_v16  ;;  %v604_v22 = vsel %vm334_vm14, %v600_v6, %v601_v14  ;;  %v588_v27 = vsel %vm61_vm0, %v584_v54, %v585_v19  ;;  %v612_v28 = vsel %vm343_vm11, %v608_v49, %v609_v21  ;;  %v1035_v63 = vld [vmem:[%s1864_s1 + $0x1a0] ss:$0 sm:$0xff] }
 0x3fb   :  { %623 = vrot.lane.b32.xlu1 %v596_v38, %s1286_s22  ;;  %v1233_v25 = vpack.i.bf16 %v604_v22, %v605_v24  ;;  %v587_v18 = vsel %vm61_vm0, %v585_v19, %v586_v4  ;;  %v611_v31 = vsel %vm343_vm11, %v609_v21, %v610_v8  ;;  %v603_v34 = vsel %vm334_vm14, %v601_v14, %v602_v29  ;;  %v847_v22 = vld [vmem:[%s1865_s2 + $0x10] sm:$0xff]  ;;  %v848_v24 = vld [vmem:[%s1865_s2 + $0x18] sm:$0xff] }
 0x3fc   :  { %v595_v35 = vsel %vm68_vm2, %v593_v16, %v594_v2  ;;  %vm968_vm0 = vcmask 1040384  }
 0x3fd   :  { %1234 = vrot.lane.b32.xlu0 %v1233_v25, %s1291_s14 }
 0x3ff   :  { %655 = vrot.lane.b32.xlu1 %v603_v34, %s1291_s14 }
 0x401   :  { %639 = vrot.lane.b32.xlu0 %v581_v10, %s1289_s11 }
 0x403   :  { %641 = vrot.lane.b32.xlu1 %v582_v61, %s1289_s11  ;;  %v846_v61 = vld [vmem:[%s1865_s2 + $0x8] sm:$0xff] }
 0x404   :  { %v1191_v62 = vpack.c.bf16 %v846_v61, %v845_v60 }
 0x405   :  { %625 = vrot.lane.b32.xlu0 %v595_v35, %s1286_s22 }
 0x406   :  { %1192 = vmatprep.subr.bf16.mxu1 %v1191_v62 }
 0x407   :  { %1194 = vmatpush3.bf16.msra.mxu1 %v1191_v62 }
 0x409   :  { %657 = vrot.lane.b32.xlu0 %v606_v36, %s1291_s14 }
 0x460   :  { %v1225_v20 = vpop.permute.xlu1 %1224 }
 0x461   :  { %v1226_v42 = vunpack.i.l.bf16 %v1225_v20  ;;  %v1227_v17 = vunpack.i.h.bf16 %v1225_v20 }
 0x46b   :  { %v1230_v37 = vpop.permute.xlu0 %1229 }
 0x46c   :  { %v1231_v39 = vunpack.i.l.bf16 %v1230_v37  ;;  %v1232_v40 = vunpack.i.h.bf16 %v1230_v37 }
 0x46d   :  { %v624_v44 = vpop.permute.xlu1 %623 }
 0x46e   :  { %v663_v32 = vsel %vm138_vm5, %v590_v48, %v1231_v39  ;;  %v664_v3 = vsel %vm138_vm5, %v589_v58, %v1232_v40  ;;  %v665_v50 = vsel %vm138_vm5, %v588_v27, %v624_v44  ;;  %v1195_v27 = vpack.c.bf16 %v848_v24, %v847_v22  ;;  %v1048_v22 = vld [vmem:[%s1865_s2 + $0x40] ss:$0 sm:$0xff] }
 0x46f   :  { %v1235_v43 = vpop.permute.xlu0 %1234  ;;  %v667_v23 = vsel %vm148_vm7, %v663_v32, %v1226_v42  ;;  %v668_v49 = vsel %vm148_vm7, %v664_v3, %v1227_v17 }
 0x470   :  { %v1236_v45 = vunpack.i.l.bf16 %v1235_v43  ;;  %v1237_v46 = vunpack.i.h.bf16 %v1235_v43  ;;  %1196 = vmatprep.subr.bf16.mxu1 %v1195_v27 }
 0x471   :  { %v656_v51 = vpop.permute.xlu1 %655  ;;  %1198 = vmatpush3.bf16.msra.mxu1 %v1195_v27 }
 0x472   :  { %v671_v47 = vsel %vm404_vm15, %v667_v23, %v1236_v45  ;;  %v672_v53 = vsel %vm404_vm15, %v668_v49, %v1237_v46 }
 0x473   :  { %v640_v9 = vpop.permute.xlu0 %639  ;;  %777 = vmatmul.mubr.f32.vlgmr.msra.gmra.mrb[4].mxu0 %v671_v47 }
 0x474   :  { %1037 = vmatprep.mubr.msk.f32.mxu0 %vm138_vm5, %v612_v28  ;;  %v669_v54 = vsel %vm148_vm7, %v665_v50, %v640_v9 }
 0x475   :  { %v673_v56 = vsel %vm404_vm15, %v669_v54, %v656_v51  ;;  %v642_v58 = vpop.permute.xlu1 %641  ;;  %v851_v54 = vld [vmem:[%s1865_s2 + $0x30] sm:$0xff] }
 0x477   :  { %v626_v11 = vpop.permute.xlu0 %625  ;;  %782 = vmatmul.mubr.f32.gmra.mrb[6].mxu0 %v672_v53 }
 0x478   :  { %1038 = vmatprep.mubr.msk.f32.mxu0 %vm138_vm5, %v611_v31  ;;  %v666_v55 = vsel %vm138_vm5, %v587_v18, %v626_v11 }
 0x479   :  { %v670_v52 = vsel %vm148_vm7, %v666_v55, %v642_v58 }
 0x47b   :  { %v658_v57 = vpop.permute.xlu0 %657  ;;  %787 = vmatmul.mubr.f32.gmra.mrb[8].mxu0 %v673_v56 }
 0x47c   :  { %1039 = vmatprep.mubr.msk.f32.mxu0 %vm138_vm5, %v614_v15  ;;  %v674_v59 = vsel %vm404_vm15, %v670_v52, %v658_v57 }
 0x47f   :  { %792 = vmatmul.mubr.f32.gmra.mrb[10].mxu0 %v674_v59 }
 0x546   :  { %v778_v0 = vpop.f32.mrb[4].mxu0 }
 0x547   :  { %v779_v1 = vadd.f32 %v1035_v63, %v778_v0  ;;  %v780_v2 = vpop.f32.mrb[5].mxu0 }
 0x549   :  { %v1040_v4 = vmul.f32 -1.442695, %v779_v1 }
 0x54a   :  { %v783_v6 = vpop.f32.mrb[6].mxu0 }
 0x54b   :  { %1270 = vpow2.f32 %v1040_v4  ;;  %v784_v8 = vadd.f32 %v1035_v63, %v783_v6  ;;  %v785_v10 = vpop.f32.mrb[7].mxu0 }
 0x54d   :  { %v1041_v41 = vmul.f32 -1.442695, %v784_v8 }
 0x54e   :  { %v788_v30 = vpop.f32.mrb[8].mxu0 }
 0x54f   :  { %1272 = vpow2.f32 %v1041_v41  ;;  %v789_v48 = vadd.f32 %v1035_v63, %v788_v30  ;;  %v790_v12 = vpop.f32.mrb[9].mxu0 }
 0x551   :  { %v1042_v13 = vmul.f32 -1.442695, %v789_v48 }
 0x552   :  { %v793_v15 = vpop.f32.mrb[10].mxu0 }
 0x553   :  { %1274 = vpow2.f32 %v1042_v13  ;;  %v794_v16 = vadd.f32 %v1035_v63, %v793_v15  ;;  %v795_v14 = vpop.f32.mrb[11].mxu0 }
 0x555   :  { %v1271_v19 = vpop.eup %1270  ;;  %v1043_v21 = vmul.f32 -1.442695, %v794_v16 }
 0x556   :  { %v809_v38 = vadd.f32 1.0, %v1271_v19 }
 0x557   :  { %1276 = vpow2.f32 %v1043_v21 }
 0x558   :  { %1278 = vrcp.f32 %v809_v38 }
 0x559   :  { %v1273_v25 = vpop.eup %1272 }
 0x55a   :  { %v810_v28 = vadd.f32 1.0, %v1273_v25 }
 0x55c   :  { %1280 = vrcp.f32 %v810_v28 }
 0x55d   :  { %v1275_v18 = vpop.eup %1274 }
 0x55e   :  { %v811_v29 = vadd.f32 1.0, %v1275_v18 }
 0x560   :  { %1282 = vrcp.f32 %v811_v29 }
 0x561   :  { %v1277_v31 = vpop.eup %1276 }
 0x562   :  { %v1279_v34 = vpop.eup %1278  ;;  %v812_v35 = vadd.f32 1.0, %v1277_v31 }
 0x563   :  { %825 = vrot.lane.b32.xlu1 %v1279_v34, %s1291_s14 }
 0x564   :  { %1284 = vrcp.f32 %v812_v35 }
 0x566   :  { %v1281_v36 = vpop.eup %1280 }
 0x567   :  { %827 = vrot.lane.b32.xlu0 %v1281_v36, %s1291_s14 }
 0x56a   :  { %v1283_v37 = vpop.eup %1282 }
 0x56b   :  { %829 = vrot.lane.b32.xlu1 %v1283_v37, %s1291_s14 }
 0x56e   :  { %v1285_v20 = vpop.eup %1284 }
 0x56f   :  { %831 = vrot.lane.b32.xlu0 %v1285_v20, %s1291_s14 }
 0x5d5   :  { %v826_v39 = vpop.permute.xlu1 %825 }
 0x5d6   :  { %v837_v40 = vmul.f32 %v826_v39, %v779_v1 }
 0x5d8   :  { %v841_v32 = vmul.f32 %v1518_v5, %v837_v40  ;;  %v850_v5 = vld [vmem:[%s1865_s2 + $0x28] sm:$0xff] }
 0x5d9   :  { %v828_v42 = vpop.permute.xlu0 %827 }
 0x5da   :  { %v838_v43 = vmul.f32 %v828_v42, %v784_v8  ;;  %1105 = vmatprep.mubr.msk.f32.mxu1 %vm138_vm5, %v841_v32 }
 0x5dc   :  { %v842_v44 = vmul.f32 %v1523_v7, %v838_v43  ;;  %v849_v7 = vld [vmem:[%s1865_s2 + $0x20] sm:$0xff] }
 0x5dd   :  { %v830_v45 = vpop.permute.xlu1 %829 }
 0x5de   :  { %v839_v23 = vmul.f32 %v830_v45, %v789_v48  ;;  %1106 = vmatmul.mubr.msk.f32.vlgmr.msra.gmra.mrb[8].mxu1 %vm138_vm5, %v842_v44 }
 0x5e0   :  { %v843_v46 = vmul.f32 %v1569_v33, %v839_v23 }
 0x5e1   :  { %v832_v47 = vpop.permute.xlu0 %831 }
 0x5e2   :  { %v840_v3 = vmul.f32 %v832_v47, %v794_v16  ;;  %1108 = vmatprep.mubr.msk.f32.mxu1 %vm138_vm5, %v843_v46 }
 0x5e4   :  { %v844_v17 = vmul.f32 %v1561_v26, %v840_v3  ;;  %v852_v26 = vld [vmem:[%s1865_s2 + $0x38] sm:$0xff] }
 0x5e6   :  { %1109 = vmatmul.mubr.msk.f32.gmra.mrb[10].mxu1 %vm138_vm5, %v844_v17 }
 0x6b1   :  { %v1107_v9 = vpop.f32.mrb[8].mxu1 }
 0x6b2   :  { %v951_v49 = vmul.f32 %v1107_v9, %v850_v5  ;;  %v931_v50 = vpop.f32.mrb[9].mxu1 }
 0x6b3   :  { %v950_v33 = vmul.f32 %v931_v50, %v849_v7 }
 0x6b5   :  { %v954_v51 = vadd.f32 %v951_v49, %v950_v33 }
 0x6b7   :  { %v955_v53 = vrot.slane %v954_v51, 4 }
 0x6b9   :  { %v956_v11 = vadd.f32 %v955_v53, %v954_v51  ;;  %v1110_v55 = vpop.f32.mrb[10].mxu1 }
 0x6ba   :  { %v953_v56 = vmul.f32 %v1110_v55, %v852_v26  ;;  %v941_v57 = vpop.f32.mrb[11].mxu1 }
 0x6bb   :  { %v952_v58 = vmul.f32 %v941_v57, %v851_v54  ;;  %v957_v52 = vrot.slane %v956_v11, 2 }
 0x6bd   :  { %v961_v59 = vadd.f32 %v953_v56, %v952_v58  ;;  %v958_v61 = vadd.f32 %v957_v52, %v956_v11 }
 0x6bf   :  { %v962_v60 = vrot.slane %v961_v59, 4  ;;  %v959_v0 = vrot.slane %v958_v61, 1 }
 0x6c1   :  { %v963_v62 = vadd.f32 %v962_v60, %v961_v59  ;;  %v960_v4 = vadd.f32 %v959_v0, %v958_v61 }
 0x6c3   :  { %v964_v63 = vrot.slane %v963_v62, 2 }
 0x6c5   :  { %v965_v1 = vadd.f32 %v964_v63, %v963_v62 }
 0x6c7   :  { %v966_v2 = vrot.slane %v965_v1, 1 }
 0x6c9   :  { %v967_v6 = vadd.f32 %v966_v2, %v965_v1 }
 0x6cb   :  { %v969_v8 = vsel %vm968_vm0, %v960_v4, %v967_v6 }
 0x6cc   :  { %975 = vrot.lane.b32.xlu0 %v969_v8, %s1291_s14  ;;  %971 = vrot.lane.b32.xlu1 %v969_v8, %s1293_s24 }
 0x6d0   :  { %983 = vrot.lane.b32.xlu0 %v969_v8, %s1289_s11  ;;  %979 = vrot.lane.b32.xlu1 %v969_v8, %s1294_s25 }
 0x6d4   :  { %991 = vrot.lane.b32.xlu0 %v969_v8, %s1286_s22  ;;  %987 = vrot.lane.b32.xlu1 %v969_v8, %s1288_s0 }
 0x6d8   :  { %995 = vrot.lane.b32.xlu1 %v969_v8, %s1287_s23 }
 0x73e   :  { %v976_v10 = vpop.permute.xlu0 %975  ;;  %v972_v41 = vpop.permute.xlu1 %971 }
 0x73f   :  { %v974_v30 = vadd.f32 %v972_v41, %v969_v8 }
 0x741   :  { %v978_v48 = vadd.f32 %v976_v10, %v974_v30 }
 0x742   :  { %v984_v12 = vpop.permute.xlu0 %983  ;;  %v980_v13 = vpop.permute.xlu1 %979 }
 0x743   :  { %v982_v15 = vadd.f32 %v980_v13, %v978_v48 }
 0x745   :  { %v986_v16 = vadd.f32 %v984_v12, %v982_v15 }
 0x746   :  { %v988_v14 = vpop.permute.xlu1 %987  ;;  %v992_v21 = vpop.permute.xlu0 %991 }
 0x747   :  { %v990_v19 = vadd.f32 %v988_v14, %v986_v16 }
 0x749   :  { %v994_v38 = vadd.f32 %v992_v21, %v990_v19 }
 0x74a   :  { %v996_v24 = vpop.permute.xlu1 %995 }
 0x74b   :  { %v998_v25 = vadd.f32 %v996_v24, %v994_v38 }
 0x74d   :  { %v1004_v27 = vadd.f32 %v1048_v22, %v998_v25 }
 0x74f   :  { %v1005_v28 = vsel %vm133_vm4, %v1004_v27, 0.0 }
 0x750   :  { %v1007_v18 = vsel %vm1006_vm1, %v1005_v28, 0.0 }
 0x751   :  { %1008 = vst [vmem:[%s1866_s3] sm:$0xff] %v1007_v18 }

</bundles_post_ra>
